<compile_context>
chip_gen: v7x
topology: tpu7x:2x2x1
jax: 0.10.0
libtpu: 0.0.40
codegen_flags: <defaults>
</compile_context>

<pallas_src>
import math

import jax
import jax.numpy as jnp
from jax.experimental import pallas as pl
from jax.experimental.pallas import tpu as pltpu

_LANE = 128
_REPACK_MAX_LANES = 4096                 # target lane width after repacking
_VMEM_LIMIT_BYTES = 32 * 1024 * 1024     # explicit scoped-VMEM budget (safe on all gens)

_tile_bytes_cache = None


def _tile_bytes():
    """Per-input-tile byte budget, generation-aware.

    Double-buffered x-in + x-out is ~4x this, so 4 MiB tiles (v6e/v7x) stay
    well under the explicit 32 MiB vmem_limit_bytes and v7x's 64 MiB physical
    VMEM; older generations (v5e's 16 MiB scoped default) get 2 MiB tiles.
    """
    global _tile_bytes_cache
    if _tile_bytes_cache is None:
        kind = ""
        try:
            kind = jax.devices()[0].device_kind.lower()
        except Exception:
            pass
        big = ("v6" in kind) or ("v7" in kind)
        _tile_bytes_cache = (4 if big else 2) * 1024 * 1024
    return _tile_bytes_cache


def _round_up(x, m):
    return ((x + m - 1) // m) * m


def _packed_sublanes(dtype):
    # f32 -> 8, bf16/f16 -> 16, int8/fp8 -> 32 (sub-32-bit packs along sublanes).
    return max(8, 32 // jnp.dtype(dtype).itemsize)


def _choose_tiles(R, L, dtype):
    """Pick (tm, tl) row/lane tile sizes for a (R, L) streaming add."""
    itemsize = jnp.dtype(dtype).itemsize
    packed = _packed_sublanes(dtype)
    budget = _tile_bytes()

    # Lane tile: full L when a packed-sublane strip fits the budget; otherwise
    # tile in multiples of 128 (only legal when L itself is a multiple of 128).
    if L % _LANE == 0:
        max_tl = max(_LANE, (budget // (packed * itemsize)) // _LANE * _LANE)
        tl = min(L, max_tl)
    else:
        tl = L  # must be full extent (cannot tile a non-multiple-of-128 lane dim)

    # Row tile: fill the remaining budget, aligned to the packed sublane count
    # (no artificial 1024-row cap).
    tm = budget // max(1, tl * itemsize)
    tm = max(packed, (tm // packed) * packed)
    tm = min(tm, _round_up(R, packed))

    # Guarantee >= 2 grid steps when possible so both v7x TensorCores get work.
    if pl.cdiv(L, tl) < 2:
        while pl.cdiv(R, tm) < 2 and tm > packed:
            tm = max(packed, ((tm // 2) // packed) * packed)
    return tm, tl


def _add_kernel(x_ref, b_ref, o_ref):
    # Elementwise add; bias block broadcasts over rows ((1, tl)) or lanes ((tm, 1)).
    o_ref[...] = x_ref[...] + b_ref[...]


def _compiler_params():
    return pltpu.CompilerParams(
        dimension_semantics=("parallel", "parallel"),
        vmem_limit_bytes=_VMEM_LIMIT_BYTES,
    )


def _add_bias_row(x2d, b_row):
    """x2d: (R, L); b_row: (1, L) broadcast over rows."""
    R, L = x2d.shape
    tm, tl = _choose_tiles(R, L, x2d.dtype)
    grid = (pl.cdiv(R, tm), pl.cdiv(L, tl))
    return pl.pallas_call(
        _add_kernel,
        out_shape=jax.ShapeDtypeStruct((R, L), x2d.dtype),
        grid_spec=pltpu.PrefetchScalarGridSpec(
            num_scalar_prefetch=0,
            grid=grid,
            in_specs=[
                pl.BlockSpec((tm, tl), lambda i, j: (i, j)),
                pl.BlockSpec((1, tl), lambda i, j: (0, j)),
            ],
            out_specs=pl.BlockSpec((tm, tl), lambda i, j: (i, j)),
        ),
        compiler_params=_compiler_params(),
    )(x2d, b_row)


def _add_bias_col(x2d, b_col):
    """x2d: (R, L); b_col: (R, 1) broadcast over the lane axis."""
    R, L = x2d.shape
    tm, tl = _choose_tiles(R, L, x2d.dtype)
    grid = (pl.cdiv(R, tm), pl.cdiv(L, tl))
    return pl.pallas_call(
        _add_kernel,
        out_shape=jax.ShapeDtypeStruct((R, L), x2d.dtype),
        grid_spec=pltpu.PrefetchScalarGridSpec(
            num_scalar_prefetch=0,
            grid=grid,
            in_specs=[
                pl.BlockSpec((tm, tl), lambda i, j: (i, j)),
                pl.BlockSpec((tm, 1), lambda i, j: (i, 0)),
            ],
            out_specs=pl.BlockSpec((tm, tl), lambda i, j: (i, j)),
        ),
        compiler_params=_compiler_params(),
    )(x2d, b_col)


def _repack_width(total, c):
    """Lane width L = k*lcm(c, 128) dividing `total`, capped near _REPACK_MAX_LANES.

    Returns None when `total` is not divisible by lcm(c, 128) (no clean repack).
    """
    base = c // math.gcd(c, _LANE) * _LANE
    if total % base != 0:
        return None
    units = total // base
    kmax = max(1, min(units, _REPACK_MAX_LANES // base))
    for k in range(kmax, 0, -1):
        if units % k == 0:
            return base * k
    return base


class AddBias:
    """JAX/Pallas port of tianshou's AddBias module (forward pass)."""

    def __init__(self, bias, *, min_pallas_bytes=256 * 1024):
        # Stored like the PyTorch parameter: bias.unsqueeze(1) -> (C, 1).
        self._bias = jnp.asarray(bias).reshape(-1, 1)
        self._min_pallas_bytes = min_pallas_bytes

    def __call__(self, x):
        C = self._bias.shape[0]
        # Note: bias is cast to x.dtype, so output keeps x.dtype; PyTorch would
        # promote (e.g. bf16 x + f32 bias -> f32).  Negligible for a bias add.
        b = self._bias[:, 0].astype(x.dtype)

        # Tiny inputs: fixed pallas_call/DMA setup cost dominates; let XLA fuse.
        if x.size * x.dtype.itemsize < self._min_pallas_bytes:
            if x.ndim == 2:
                return x + b.reshape(1, C)
            return x + b.reshape(1, C, 1, 1)

        if x.ndim == 2:
            N = x.shape[0]
            L = _repack_width(N * C, C)
            if L is not None:
                # Lane-dense repack: wide multiple-of-128 lane axis; the bias
                # row is tiled with the same period (layout plumbing only).
                x2 = x.reshape((N * C) // L, L)
                b_row = jnp.tile(b, L // C).reshape(1, L)
                return _add_bias_row(x2, b_row).reshape(N, C)
            # Fallback: C on the lane axis (possibly masked tail).
            return _add_bias_row(x, b.reshape(1, C))

        assert x.ndim == 4, "AddBias expects 2D (N, C) or 4D (N, C, H, W) input"
        N, _, H, W = x.shape
        hw = H * W

        if hw < _LANE:
            # Small spatial extent: fold C into the lane axis so traffic stays
            # lane-dense; bias is pre-broadcast to the (C*hw,) row pattern.
            chw = C * hw
            b_pat = jnp.broadcast_to(b[:, None], (C, hw)).reshape(chw)
            L = _repack_width(N * chw, chw)
            if L is not None:
                x2 = x.reshape((N * chw) // L, L)
                b_row = jnp.tile(b_pat, L // chw).reshape(1, L)
            else:
                x2 = x.reshape(N, chw)
                b_row = b_pat.reshape(1, chw)
            return _add_bias_row(x2, b_row).reshape(N, C, H, W)

        # hw >= 128: rows of (N*C, hw) with a per-row bias column; hw is column-
        # tiled in multiples of 128 whenever a row exceeds the tile budget.
        x2 = x.reshape(N * C, hw)
        b_col = jnp.tile(b, N).reshape(N * C, 1)
        return _add_bias_col(x2, b_col).reshape(N, C, H, W)


if __name__ == "__main__":
    key = jax.random.PRNGKey(0)
    k1, k2, k3, k4, k5 = jax.random.split(key, 5)

    C = 4
    bias = jax.random.normal(k1, (C,), dtype=jnp.float32)
    # min_pallas_bytes=0 so the small test shapes exercise the Pallas kernels
    # (the default threshold would route them to the jnp fast path).
    mod = AddBias(bias, min_pallas_bytes=0)

    # 4D, hw >= 128 (bias-column path): NCHW (2, 4, 16, 16).
    x4 = jax.random.normal(k2, (2, C, 16, 16), dtype=jnp.float32)
    y4 = jax.block_until_ready(mod(x4))
    ref4 = x4 + bias.reshape(1, C, 1, 1)
    assert jnp.allclose(y4, ref4, atol=1e-6), "4D (hw>=128) mismatch"

    # 4D, hw < 128 (C folded into the lane axis): NCHW (2, 4, 7, 7).
    x4s = jax.random.normal(k3, (2, C, 7, 7), dtype=jnp.float32)
    y4s = jax.block_until_ready(mod(x4s))
    ref4s = x4s + bias.reshape(1, C, 1, 1)
    assert jnp.allclose(y4s, ref4s, atol=1e-6), "4D (hw<128) mismatch"

    # 2D, un-repacked fallback (N*C not a multiple of lcm(C,128)): (2, 4).
    x2 = jax.random.normal(k4, (2, C), dtype=jnp.float32)
    y2 = jax.block_until_ready(mod(x2))
    ref2 = x2 + bias.reshape(1, C)
    assert jnp.allclose(y2, ref2, atol=1e-6), "2D fallback mismatch"

    # 2D, lane-dense repack (N*C multiple of lcm(C,128)=128): (64, 4).
    x2b = jax.random.normal(k5, (64, C), dtype=jnp.float32)
    y2b = jax.block_until_ready(mod(x2b))
    ref2b = x2b + bias.reshape(1, C)
    assert jnp.allclose(y2b, ref2b, atol=1e-6), "2D repacked mismatch"

    print("KERNEL_OK")
</pallas_src>

<mosaic_0001>
module attributes {stable_mosaic.version = 11 : i64} {
  func.func @_add_kernel(%arg0: i32, %arg1: i32, %arg2: memref<8x256xf32, #tpu.memory_space<vmem>>, %arg3: memref<8x1xf32, #tpu.memory_space<vmem>>, %arg4: memref<8x256xf32, #tpu.memory_space<vmem>>) attributes {dimension_semantics = [#tpu.dimension_semantics<parallel>, #tpu.dimension_semantics<parallel>], iteration_bounds = array<i64: 1, 1>, scalar_prefetch = 0 : i64, scratch_operands = 0 : i64, tpu.core_type = #tpu.core_type<tc>, window_params = [{transform_indices = @transform_0, window_bounds = array<i64: 8, 256>}, {transform_indices = @transform_1, window_bounds = array<i64: 8, 1>}, {transform_indices = @transform_2, window_bounds = array<i64: 8, 256>}]} {
    %c0 = arith.constant 0 : index
    %c0_0 = arith.constant 0 : index
    %0 = vector.load %arg2[%c0, %c0_0] : memref<8x256xf32, #tpu.memory_space<vmem>>, vector<8x256xf32>
    %c0_1 = arith.constant 0 : index
    %c0_2 = arith.constant 0 : index
    %1 = vector.load %arg3[%c0_1, %c0_2] : memref<8x1xf32, #tpu.memory_space<vmem>>, vector<8x1xf32>
    %2 = vector.broadcast %1 : vector<8x1xf32> to vector<8x256xf32>
    %3 = arith.addf %0, %2 : vector<8x256xf32>
    %c0_3 = arith.constant 0 : index
    %c0_4 = arith.constant 0 : index
    %4 = vector.load %arg4[%c0_3, %c0_4] : memref<8x256xf32, #tpu.memory_space<vmem>>, vector<8x256xf32>
    tpu.vector_store %arg4[%c0_3, %c0_4], %3 {strides = array<i32>} : memref<8x256xf32, #tpu.memory_space<vmem>>, vector<8x256xf32>,
    return
  }
  func.func @transform_0(%arg0: i32, %arg1: i32) -> (i32, i32) {
    %c0_i32 = arith.constant 0 : i32
    return %arg0, %arg1 : i32, i32
  }
  func.func @transform_1(%arg0: i32, %arg1: i32) -> (i32, i32) {
    %c0_i32 = arith.constant 0 : i32
    %c0_i32_0 = arith.constant 0 : i32
    return %arg0, %c0_i32 : i32, i32
  }
  func.func @transform_2(%arg0: i32, %arg1: i32) -> (i32, i32) {
    %c0_i32 = arith.constant 0 : i32
    return %arg0, %arg1 : i32, i32
  }
}

</mosaic_0001>

<bundles_post_ra>
// kernel: tpu_custom_call.1
= control target key start
LH: loop header
LB: loop body
LE: loop exit
PB: predicated region body
PF: predicated region fallthrough
CT: control target
= control target key end

     0   :  { %7 = vsyncpa [#allocation3], 0  ;;  %s148_s0 = inlined_call_operand.hbm [shape: f32[8,256], index: 0, kind: input, shape index: {}]   ;;  %s149_s1 = inlined_call_operand.vmem [shape: f32[8,1], index: 1, kind: input, shape index: {}]   ;;  %s150_s2 = inlined_call_operand.hbm [shape: f32[8,256], index: 2, kind: output, shape index: {}]  }
   0x1   :  { %8 = vsyncpa [#allocation4], 0  ;;  %s103_s9 = smov [#allocation2]   ;;  %s55_s13 = scalar_lea.hbm %s148_s0, 256 }
   0x2   :  { %s15_s10 = sshll.u32 %s103_s9, 4  ;;  %p56_p0 = scmp.ne.s32.totalorder %s148_s0, %s55_s13  ;;  %s16_s10 = int_to_ptr.vmem [resolvable:$true] %s15_s10 }
   0x3   :  { %p59_p1 = scmp.lt.u32.totalorder %s55_s13, %s148_s0 }
   0x5   :  { %p61_p2 = pnand %p59_p1, %p56_p0 }
   0x7   :  { %64 = shalt.err (!%p61_p2)
}
   0x8   :  { %s65_s18 = scalar_lea.vmem %s16_s10, 256  ;;  %p70_p4 = scmp.lt.s32.totalorder %s16_s10, %s16_s10 }
   0x9   :  { %p66_p3 = scmp.ne.s32.totalorder %s16_s10, %s65_s18  ;;  %p71_p5 = scmp.lt.s32.totalorder %s65_s18, %s65_s18 }
   0xb   :  { %p72_p6 = por %p71_p5, %p70_p4 }
   0xd   :  { %p73_p7 = pnand %p72_p6, %p66_p3 }
   0xf   :  { %76 = shalt.err (!%p73_p7)
}
  0x10   :  { %18 = dma.hbm_to_vmem [thread:$0]  %s148_s0, 256, %s16_s10, [#allocation3]  }
  0x11   :  { %99 = dma.done.wait [#allocation3], 256  }
  0x12   :  { %100 = vsyncadd [#allocation3], 4294967040  ;;  %v104_v0 = vmov 0   ;;  %v26_v1 = vld [vmem:[%s149_s1] sm:$0xff]  ;;  %v25_v3 = vld [vmem:[#allocation2 + $0x8] sm:$0xff]  ;;  %s105_s23 = smov [#allocation5]  }
  0x13   :  { %54 = vset.pattern.permute.xlu0 %v104_v0  ;;  %v24_v2 = vld [vmem:[#allocation2] sm:$0xff]  ;;  %s42_s24 = sshll.u32 %s105_s23, 4  ;;  %s43_s24 = int_to_ptr.vmem [resolvable:$true] %s42_s24 }
  0x14   :  { %29 = vperm.xlu0 %54, %v26_v1   ;;  %s77_s0 = scalar_lea.vmem %s43_s24, 256  ;;  %p82_p9 = scmp.lt.s32.totalorder %s43_s24, %s43_s24 }
  0x15   :  { %p78_p8 = scmp.ne.s32.totalorder %s43_s24, %s77_s0  ;;  %p83_p10 = scmp.lt.s32.totalorder %s77_s0, %s77_s0 }
  0x17   :  { %p84_p11 = por %p83_p10, %p82_p9 }
  0x19   :  { %p85_p12 = pnand %p84_p11, %p78_p8 }
  0x93   :  { %v30_v4 = vpop.permute.xlu0 %29 }
  0x94   :  { %v32_v5 = vadd.f32 %v30_v4, %v24_v2  ;;  %v33_v6 = vadd.f32 %v30_v4, %v25_v3 }
  0x96   :  { %34 = vst [vmem:[#allocation5] sm:$0xff] %v32_v5  ;;  %35 = vst [vmem:[#allocation5 + $0x8] sm:$0xff] %v33_v6 }
  0x97   :  { %88 = shalt.err (!%p85_p12)
}
  0x98   :  { %s89_s26 = scalar_lea.hbm %s150_s2, 256 }
  0x99   :  { %p90_p13 = scmp.ne.s32.totalorder %s150_s2, %s89_s26  ;;  %p93_p0 = scmp.lt.u32.totalorder %s89_s26, %s150_s2 }
  0x9b   :  { %p95_p1 = pnand %p93_p0, %p90_p13 }
  0x9d   :  { %98 = shalt.err (!%p95_p1)
}
  0x9e   :  { %45 = dma.vmem_to_hbm [thread:$0]  %s43_s24, 256, %s150_s2, [#allocation4]  }
  0x9f   :  { %101 = dma.done.wait [#allocation4], 256  }
  0xa0   :  { %102 = vsyncadd [#allocation4], 4294967040 }
  0xa1   :  { %49 = vsyncpa [#allocation3], 1 }
  0xa2   :  { %50 = vsyncpa [#allocation4], 1 }

</bundles_post_ra>
